<compile_context>
chip_gen: v6e
topology: v6e:2x2x1
jax: 0.10.0
libtpu: 0.0.40
codegen_flags: <defaults>
</compile_context>

<pallas_src>
import functools

import jax
import jax.numpy as jnp
from jax import lax
from jax.experimental import pallas as pl
from jax.experimental.pallas import tpu as pltpu


def _conv_stats_kernel(x_ref, w_ref, conv_ref, psum_ref, psumsq_ref, *, TH, W, Cin):
    """3x3 same-conv for one (batch, H-tile) block via a single im2col matmul.

    x_ref:      (1, H+2, W+2, Cin)   bf16, zero-padded input image n (resident per n)
    w_ref:      (9*Cin, Cout_p)      bf16, weights as (ky*kx*ci, co), co padded to 128
    conv_ref:   (1, TH, W, Cout_p)   f32 conv output tile (lane-dense)
    psum_ref:   (1, 1, 1, Cout_p)    f32 per-channel sum over this tile
    psumsq_ref: (1, 1, 1, Cout_p)    f32 per-channel sum of squares over this tile
    """
    Cout_p = w_ref.shape[-1]
    row0 = pl.multiple_of(pl.program_id(1) * TH, TH)

    # One dynamic slice for the row band (+halo); taps below are static slices.
    xband = x_ref[0, pl.ds(row0, TH + 2), :, :]          # (TH+2, W+2, Cin)

    # im2col: tap order (dy, dx, cin) matches the weight row layout.
    patches = jnp.concatenate(
        [xband[dy:dy + TH, dx:dx + W, :] for dy in range(3) for dx in range(3)],
        axis=-1,
    ).reshape(TH * W, 9 * Cin)                           # (TH*W, 9*Cin) bf16

    # Single MXU dot, f32 accumulation.
    conv = jnp.dot(patches, w_ref[...], preferred_element_type=jnp.float32)

    conv_ref[...] = conv.reshape(1, TH, W, Cout_p)
    psum_ref[...] = jnp.sum(conv, axis=0).reshape(1, 1, 1, Cout_p)
    psumsq_ref[...] = jnp.sum(conv * conv, axis=0).reshape(1, 1, 1, Cout_p)


def _bn_relu_kernel(c_ref, scale_ref, shift_ref, o_ref):
    """Elementwise epilogue: y = relu(conv * scale + shift) (lane-dense blocks)."""
    y = jnp.maximum(c_ref[...] * scale_ref[...] + shift_ref[...], 0.0)
    o_ref[...] = y.astype(o_ref.dtype)


def block_forward(x_nchw, w_oihw, bias, gamma, beta, *, eps=1e-5):
    """Runs the fused block. Input/output are NCHW to match PyTorch."""
    del bias  # exactly cancelled by training-mode BN mean subtraction (no-op)

    N, Cin, H, W = x_nchw.shape
    Cout = w_oihw.shape[0]
    Cout_p = ((Cout + 127) // 128) * 128            # lane-dense channel padding
    TH = 8 if H % 8 == 0 else H                     # H-tile (rows per grid step)
    Hb = H // TH

    # Layout glue (boundary only): NCHW -> NHWC, zero-pad halo, bf16 operands,
    # weights OIHW -> (ky*kx*ci, co) padded to Cout_p.
    x = jnp.transpose(x_nchw, (0, 2, 3, 1))
    x = jnp.pad(x, ((0, 0), (1, 1), (1, 1), (0, 0))).astype(jnp.bfloat16)
    w = jnp.transpose(w_oihw, (2, 3, 1, 0)).reshape(9 * Cin, Cout)
    w = jnp.pad(w, ((0, 0), (0, Cout_p - Cout))).astype(jnp.bfloat16)

    cparams = pltpu.CompilerParams(
        dimension_semantics=("parallel", "parallel"),
        vmem_limit_bytes=32 * 1024 * 1024,
    )

    # ---- Phase 1: conv + per-tile channel statistics ----
    kern1 = functools.partial(_conv_stats_kernel, TH=TH, W=W, Cin=Cin)
    conv, psum, psumsq = pl.pallas_call(
        kern1,
        out_shape=(
            jax.ShapeDtypeStruct((N, H, W, Cout_p), jnp.float32),
            jax.ShapeDtypeStruct((N, Hb, 1, Cout_p), jnp.float32),
            jax.ShapeDtypeStruct((N, Hb, 1, Cout_p), jnp.float32),
        ),
        grid=(N, Hb),
        in_specs=[
            pl.BlockSpec((1, H + 2, W + 2, Cin), lambda n, h: (n, 0, 0, 0)),
            pl.BlockSpec((9 * Cin, Cout_p), lambda n, h: (0, 0)),
        ],
        out_specs=(
            pl.BlockSpec((1, TH, W, Cout_p), lambda n, h: (n, h, 0, 0)),
            pl.BlockSpec((1, 1, 1, Cout_p), lambda n, h: (n, h, 0, 0)),
            pl.BlockSpec((1, 1, 1, Cout_p), lambda n, h: (n, h, 0, 0)),
        ),
        compiler_params=cparams,
    )(x, w)

    # ---- Fold global batch statistics into per-channel scale/shift (tiny) ----
    count = jnp.float32(N * H * W)
    ch_sum = jnp.sum(psum, axis=(0, 1, 2))          # (Cout_p,)
    ch_sumsq = jnp.sum(psumsq, axis=(0, 1, 2))      # (Cout_p,)
    mean = ch_sum / count
    var = jnp.maximum(ch_sumsq / count - mean * mean, 0.0)
    gamma_p = jnp.pad(gamma.astype(jnp.float32), (0, Cout_p - Cout))
    beta_p = jnp.pad(beta.astype(jnp.float32), (0, Cout_p - Cout))
    scale = (gamma_p * lax.rsqrt(var + eps)).reshape(1, 1, 1, Cout_p)
    shift = (beta_p - mean * gamma_p * lax.rsqrt(var + eps)).reshape(1, 1, 1, Cout_p)

    # ---- Phase 2: normalize + ReLU (elementwise, lane-dense) ----
    y = pl.pallas_call(
        _bn_relu_kernel,
        out_shape=jax.ShapeDtypeStruct((N, H, W, Cout_p), x_nchw.dtype),
        grid=(N, Hb),
        in_specs=[
            pl.BlockSpec((1, TH, W, Cout_p), lambda n, h: (n, h, 0, 0)),
            pl.BlockSpec((1, 1, 1, Cout_p), lambda n, h: (0, 0, 0, 0)),
            pl.BlockSpec((1, 1, 1, Cout_p), lambda n, h: (0, 0, 0, 0)),
        ],
        out_specs=pl.BlockSpec((1, TH, W, Cout_p), lambda n, h: (n, h, 0, 0)),
        compiler_params=cparams,
    )(conv, scale, shift)

    # Back to PyTorch layout: drop channel padding, NHWC -> NCHW.
    return jnp.transpose(y[..., :Cout], (0, 3, 1, 2))


def _reference(x_nchw, w_oihw, bias, gamma, beta, eps=1e-5):
    """Pure-JAX reference (same semantics; conv operands also in bf16)."""
    x = jnp.transpose(x_nchw, (0, 2, 3, 1))           # NHWC
    w = jnp.transpose(w_oihw, (2, 3, 1, 0))           # HWIO
    conv = lax.conv_general_dilated(
        x.astype(jnp.bfloat16), w.astype(jnp.bfloat16),
        window_strides=(1, 1), padding="SAME",
        dimension_numbers=("NHWC", "HWIO", "NHWC"),
        preferred_element_type=jnp.float32,
    ) + bias
    mean = jnp.mean(conv, axis=(0, 1, 2), keepdims=True)
    var = jnp.mean((conv - mean) ** 2, axis=(0, 1, 2), keepdims=True)
    y = (conv - mean) * lax.rsqrt(var + eps) * gamma + beta
    y = jnp.maximum(y, 0.0)
    return jnp.transpose(y, (0, 3, 1, 2)).astype(x_nchw.dtype)


if __name__ == "__main__":
    # Small shapes consistent with the module.
    N, Cin, Cout, H, W = 2, 4, 8, 16, 16

    key = jax.random.PRNGKey(0)
    kx, kw, kb = jax.random.split(key, 3)

    x = jax.random.normal(kx, (N, Cin, H, W), dtype=jnp.float32)
    # PyTorch parameter shapes: OIHW weight, (Cout,) bias / BN gamma / BN beta.
    w = 0.1 * jax.random.normal(kw, (Cout, Cin, 3, 3), dtype=jnp.float32)
    b = 0.05 * jax.random.normal(kb, (Cout,), dtype=jnp.float32)
    gamma = jnp.ones((Cout,), dtype=jnp.float32)   # BatchNorm2d weight init
    beta = jnp.zeros((Cout,), dtype=jnp.float32)   # BatchNorm2d bias init

    out = jax.block_until_ready(block_forward(x, w, b, gamma, beta))
    ref = jax.block_until_ready(_reference(x, w, b, gamma, beta))

    assert out.shape == (N, Cout, H, W)
    assert jnp.allclose(out, ref, atol=1e-3, rtol=1e-3)

    print("KERNEL_OK")
</pallas_src>

<mosaic_0001>
module attributes {stable_mosaic.version = 11 : i64} {
  func.func @_conv_stats_kernel(%arg0: i32, %arg1: i32, %arg2: memref<1x18x18x4xbf16, #tpu.memory_space<vmem>>, %arg3: memref<36x128xbf16, #tpu.memory_space<vmem>>, %arg4: memref<1x8x16x128xf32, #tpu.memory_space<vmem>>, %arg5: memref<1x1x1x128xf32, #tpu.memory_space<vmem>>, %arg6: memref<1x1x1x128xf32, #tpu.memory_space<vmem>>) attributes {dimension_semantics = [#tpu.dimension_semantics<parallel>, #tpu.dimension_semantics<parallel>], iteration_bounds = array<i64: 2, 2>, scalar_prefetch = 0 : i64, scratch_operands = 0 : i64, tpu.core_type = #tpu.core_type<tc>, window_params = [{transform_indices = @transform_0, window_bounds = array<i64: 1, 18, 18, 4>}, {pipeline_mode = #tpu.pipeline_mode<synchronous>, transform_indices = @transform_1, window_bounds = array<i64: 36, 128>}, {transform_indices = @transform_2, window_bounds = array<i64: 1, 8, 16, 128>}, {transform_indices = @transform_3, window_bounds = array<i64: 1, 1, 1, 128>}, {transform_indices = @transform_4, window_bounds = array<i64: 1, 1, 1, 128>}]} {
    %c8_i32 = arith.constant 8 : i32
    %0 = arith.muli %arg1, %c8_i32 : i32
    %1 = tpu.assume_multiple %0, 8 : i32
    %c0 = arith.constant 0 : index
    %2 = arith.index_cast %1 : i32 to index
    %c0_0 = arith.constant 0 : index
    %c0_1 = arith.constant 0 : index
    %3 = vector.load %arg2[%c0, %2, %c0_0, %c0_1] : memref<1x18x18x4xbf16, #tpu.memory_space<vmem>>, vector<1x10x18x4xbf16>
    %4 = vector.shape_cast %3 : vector<1x10x18x4xbf16> to vector<10x18x4xbf16>
    %5 = vector.extract_strided_slice %4 {offsets = [0, 0, 0], sizes = [8, 16, 4], strides = [1, 1, 1]} : vector<10x18x4xbf16> to vector<8x16x4xbf16>
    %6 = vector.extract_strided_slice %4 {offsets = [0, 1, 0], sizes = [8, 16, 4], strides = [1, 1, 1]} : vector<10x18x4xbf16> to vector<8x16x4xbf16>
    %7 = vector.extract_strided_slice %4 {offsets = [0, 2, 0], sizes = [8, 16, 4], strides = [1, 1, 1]} : vector<10x18x4xbf16> to vector<8x16x4xbf16>
    %8 = vector.extract_strided_slice %4 {offsets = [1, 0, 0], sizes = [8, 16, 4], strides = [1, 1, 1]} : vector<10x18x4xbf16> to vector<8x16x4xbf16>
    %9 = vector.extract_strided_slice %4 {offsets = [1, 1, 0], sizes = [8, 16, 4], strides = [1, 1, 1]} : vector<10x18x4xbf16> to vector<8x16x4xbf16>
    %10 = vector.extract_strided_slice %4 {offsets = [1, 2, 0], sizes = [8, 16, 4], strides = [1, 1, 1]} : vector<10x18x4xbf16> to vector<8x16x4xbf16>
    %11 = vector.extract_strided_slice %4 {offsets = [2, 0, 0], sizes = [8, 16, 4], strides = [1, 1, 1]} : vector<10x18x4xbf16> to vector<8x16x4xbf16>
    %12 = vector.extract_strided_slice %4 {offsets = [2, 1, 0], sizes = [8, 16, 4], strides = [1, 1, 1]} : vector<10x18x4xbf16> to vector<8x16x4xbf16>
    %13 = vector.extract_strided_slice %4 {offsets = [2, 2, 0], sizes = [8, 16, 4], strides = [1, 1, 1]} : vector<10x18x4xbf16> to vector<8x16x4xbf16>
    %14 = tpu.concatenate %5, %6, %7, %8, %9, %10, %11, %12, %13 in 2 : vector<8x16x4xbf16>, vector<8x16x4xbf16>, vector<8x16x4xbf16>, vector<8x16x4xbf16>, vector<8x16x4xbf16>, vector<8x16x4xbf16>, vector<8x16x4xbf16>, vector<8x16x4xbf16>, vector<8x16x4xbf16> -> vector<8x16x36xbf16>
    %15 = vector.shape_cast %14 : vector<8x16x36xbf16> to vector<128x36xbf16>
    %c0_2 = arith.constant 0 : index
    %c0_3 = arith.constant 0 : index
    %16 = vector.load %arg3[%c0_2, %c0_3] : memref<36x128xbf16, #tpu.memory_space<vmem>>, vector<36x128xbf16>
    %cst = arith.constant dense<0.000000e+00> : vector<128x128xf32>
    %17 = tpu.matmul %15, %16, %cst {dimension_numbers = #tpu.dot_dimension_numbers<[1], [0], [0], [1], [0, 0, 1, 1], [], []>} : vector<128x36xbf16>, vector<36x128xbf16>, vector<128x128xf32> -> vector<128x128xf32>
    %18 = vector.shape_cast %17 : vector<128x128xf32> to vector<1x8x16x128xf32>
    %c0_4 = arith.constant 0 : index
    %c0_5 = arith.constant 0 : index
    %c0_6 = arith.constant 0 : index
    %c0_7 = arith.constant 0 : index
    %19 = vector.load %arg4[%c0_4, %c0_5, %c0_6, %c0_7] : memref<1x8x16x128xf32, #tpu.memory_space<vmem>>, vector<1x8x16x128xf32>
    tpu.vector_store %arg4[%c0_4, %c0_5, %c0_6, %c0_7], %18 {strides = array<i32>} : memref<1x8x16x128xf32, #tpu.memory_space<vmem>>, vector<1x8x16x128xf32>,
    %cst_8 = arith.constant dense<0.000000e+00> : vector<128xf32>
    %20 = vector.multi_reduction <add>, %17, %cst_8 [0] : vector<128x128xf32> to vector<128xf32>
    %21 = vector.shape_cast %20 : vector<128xf32> to vector<1x1x1x128xf32>
    %c0_9 = arith.constant 0 : index
    %c0_10 = arith.constant 0 : index
    %c0_11 = arith.constant 0 : index
    %c0_12 = arith.constant 0 : index
    %22 = vector.load %arg5[%c0_9, %c0_10, %c0_11, %c0_12] : memref<1x1x1x128xf32, #tpu.memory_space<vmem>>, vector<1x1x1x128xf32>
    tpu.vector_store %arg5[%c0_9, %c0_10, %c0_11, %c0_12], %21 {strides = array<i32>} : memref<1x1x1x128xf32, #tpu.memory_space<vmem>>, vector<1x1x1x128xf32>,
    %23 = arith.mulf %17, %17 : vector<128x128xf32>
    %cst_13 = arith.constant dense<0.000000e+00> : vector<128xf32>
    %24 = vector.multi_reduction <add>, %23, %cst_13 [0] : vector<128x128xf32> to vector<128xf32>
    %25 = vector.shape_cast %24 : vector<128xf32> to vector<1x1x1x128xf32>
    %c0_14 = arith.constant 0 : index
    %c0_15 = arith.constant 0 : index
    %c0_16 = arith.constant 0 : index
    %c0_17 = arith.constant 0 : index
    %26 = vector.load %arg6[%c0_14, %c0_15, %c0_16, %c0_17] : memref<1x1x1x128xf32, #tpu.memory_space<vmem>>, vector<1x1x1x128xf32>
    tpu.vector_store %arg6[%c0_14, %c0_15, %c0_16, %c0_17], %25 {strides = array<i32>} : memref<1x1x1x128xf32, #tpu.memory_space<vmem>>, vector<1x1x1x128xf32>,
    return
  }
  func.func @transform_0(%arg0: i32, %arg1: i32) -> (i32, i32, i32, i32) {
    %c0_i32 = arith.constant 0 : i32
    %c0_i32_0 = arith.constant 0 : i32
    %c0_i32_1 = arith.constant 0 : i32
    %c0_i32_2 = arith.constant 0 : i32
    return %arg0, %c0_i32, %c0_i32_0, %c0_i32_1 : i32, i32, i32, i32
  }
  func.func @transform_1(%arg0: i32, %arg1: i32) -> (i32, i32) {
    %c0_i32 = arith.constant 0 : i32
    %c0_i32_0 = arith.constant 0 : i32
    %c0_i32_1 = arith.constant 0 : i32
    return %c0_i32, %c0_i32_0 : i32, i32
  }
  func.func @transform_2(%arg0: i32, %arg1: i32) -> (i32, i32, i32, i32) {
    %c0_i32 = arith.constant 0 : i32
    %c0_i32_0 = arith.constant 0 : i32
    %c0_i32_1 = arith.constant 0 : i32
    return %arg0, %arg1, %c0_i32, %c0_i32_0 : i32, i32, i32, i32
  }
  func.func @transform_3(%arg0: i32, %arg1: i32) -> (i32, i32, i32, i32) {
    %c0_i32 = arith.constant 0 : i32
    %c0_i32_0 = arith.constant 0 : i32
    %c0_i32_1 = arith.constant 0 : i32
    return %arg0, %arg1, %c0_i32, %c0_i32_0 : i32, i32, i32, i32
  }
  func.func @transform_4(%arg0: i32, %arg1: i32) -> (i32, i32, i32, i32) {
    %c0_i32 = arith.constant 0 : i32
    %c0_i32_0 = arith.constant 0 : i32
    %c0_i32_1 = arith.constant 0 : i32
    return %arg0, %arg1, %c0_i32, %c0_i32_0 : i32, i32, i32, i32
  }
}

</mosaic_0001>

<bundles_post_ra>
// kernel: tpu_custom_call.1
= control target key start
LH: loop header
LB: loop body
LE: loop exit
PB: predicated region body
PF: predicated region fallthrough
CT: control target
= control target key end

     0   :  { %10 = vsyncpa [#allocation3], 0  ;;  %s2116_s0 = inlined_call_operand.vmem [shape: bf16[2,18,18,4], index: 0, kind: input, shape index: {}]   ;;  %s2117_s1 = inlined_call_operand.vmem [shape: bf16[36,128], index: 1, kind: input, shape index: {}]   ;;  %s2118_s2 = inlined_call_operand.hbm [shape: f32[2,16,16,128], index: 2, kind: output, shape index: {0}]   ;;  %s2119_s3 = inlined_call_operand.hbm [shape: f32[2,2,1,128], index: 3, kind: output, shape index: {1}]   ;;  %s2120_s4 = inlined_call_operand.hbm [shape: f32[2,2,1,128], index: 4, kind: output, shape index: {2}]  }
   0x1   :  { %12 = vsyncpa [#allocation3 + $0x1], 0 }
   0x2   :  { %13 = vsyncpa [#allocation5], 0 }
   0x3   :  { %15 = vsyncpa [#allocation5 + $0x1], 0  ;;  %s1562_s15 = smov 0   ;;  %s1564_s16 = smov 0  }
   0x4   :  { %s1566_s17 = smov 0   ;;  %s1568_s18 = smov 0  }
   0x5   :  { %s1570_s19 = smov 0   ;;  %s1572_s20 = smov 0  }
   0x6   :  { %s1574_s21 = smov 0   ;;  %s1576_s22 = smov 0  }
   0x7 LB: > { %s2122_s23 = sadd.s32 4294967295, %s1523_s22   ;;  %s2121_s24 = sadd.s32 4294967294, %s1523_s22   ;;  %s1523_s22 = sphi %s1576_s22, %s21_s22   ;;  %s1519_s21 = sphi %s1574_s21, %s2137_s21   ;;  %s1515_s20 = sphi %s1572_s20, %s2136_s20   ;;  %s1511_s19 = sphi %s1570_s19, %s2135_s19   ;;  %s1507_s18 = sphi %s1568_s18, %s2134_s18   ;;  %s1503_s17 = sphi %s1566_s17, %s2133_s17   ;;  %s1499_s16 = sphi %s1564_s16, %s2132_s16   ;;  %s1495_s15 = sphi %s1562_s15, %s2131_s15  }
   0x8   : > { %s30_s25 = sadd.s32 1, %s1515_s20  ;;  %s33_s26 = sadd.s32 1, %s1519_s21 }
   0x9   : > { %p31_p0 = scmp.ge.s32.totalorder %s30_s25, 2  ;;  %p99_p1 = scmp.ne.s32.totalorder %s1503_s17, %s1499_s16 }
   0xa   : > { %p100_p2 = scmp.eq.s32.totalorder %s2122_s23, 3  ;;  %p105_p5 = scmp.ne.s32.totalorder %s1499_s16, %s1495_s15 }
   0xb   : > { %s2139_s25 = smov (%p31_p0, %s30_s25), 0  ;;  %s2141_s26 = smov (!%p31_p0, %s33_s26), %s1519_s21 }
   0xc   : > { %s85_s27 = ssub.s32 %s1515_s20, %s2139_s25  ;;  %p1615_p3 = por %p100_p2, %p99_p1 }
   0xd   : > { %p35_p4 = scmp.ge.s32.totalorder %s2141_s26, 2  ;;  %p106_p6 = scmp.eq.s32.totalorder %s2121_s24, 3 }
   0xe   : > { %p1170_p7 = scmp.ge.s32.totalorder %s1523_s22, 1  ;;  %p191_p9 = scmp.lt.s32.totalorder %s1523_s22, 5 }
   0xf   : > { %s2143_s26 = smov (%p35_p4, %s2141_s26), 0  ;;  %p1626_p8 = por %p106_p6, %p105_p5 }
  0x10   : > { %s84_s30 = ssub.s32 %s1519_s21, %s2143_s26  ;;  %s89_s5 = sadd.s32 1, %s1503_s17 }
  0x11   : > { %s86_s6 = sor.u32 %s85_s27, %s84_s30  ;;  %p192_p10 = pnand %p1170_p7, %p191_p9 }
  0x12   : > { %p87_p11 = scmp.eq.s32.totalorder %s86_s6, 0  ;;  %p225_p12 = scmp.lt.s32.totalorder (!%p192_p10), %s1511_s19, 1 }
  0x13   : > { %195 = sbr.rel (%p192_p10) target bundleno = 534 (0x216), region = 28  ;;  %s1525_s27 = smov (!%p192_p10), 12  }
  0x14   : > { %s1635_s7 = scalar_select %p87_p11, %s1503_s17, %s89_s5  }
  0x15   : > { %s1218_s9 = smul.u32 (!%p192_p10), 96, %s1507_s18  ;;  %s1526_s30 = smov (!%p192_p10), 20  }
  0x16   : > { %s1527_s5 = smov (!%p192_p10), 8   ;;  %s1528_s6 = smov (!%p192_p10), 4  }
  0x17   : > { %s1532_s12 = smov (!%p192_p10), 32  }
  0x18   : > { %s226_s8 = scalar_select %p225_p12, %s1511_s19, 1  ;;  %vm443_vm0 = vcmask 1046528   ;;  %vm330_vm1 = vsmask.f32 7424  ;;  %vm799_vm2 = vcmask 1041408   ;;  %vm626_vm3 = vcmask 31744  }
  0x19   : > { %vm643_vm4 = vcmask 64512   ;;  %vm660_vm5 = vcmask 97280   ;;  %vm677_vm6 = vcmask 130048   ;;  %vm694_vm7 = vcmask 162816  }
  0x1a   : > { %s1261_s10 = smul.u32 216, %s226_s8  ;;  %s1529_s8 = smov 16   ;;  %vm711_vm8 = vcmask 195584   ;;  %vm728_vm9 = vcmask 228352   ;;  %vm745_vm10 = vcmask 261120   ;;  %vm782_vm11 = vcmask 293888  }
  0x1c   : > { %s229_s13 = scalar_lea.vmem %s2116_s0, %s1261_s10  ;;  %s1531_s10 = smov 28  }
  0x1d   : > { %s1643_s14 = scalar_lea.vmem %s229_s13, %s1218_s9  ;;  %s1530_s9 = smov 24  }
  0x1e   : > { %v1646_v0 = vld [vmem:[%s1643_s14 + $0x18] sm:$0xff]   ;;  %v1649_v1 = vld [vmem:[%s1643_s14 + $0xc] sm:$0xff]   ;;  %v1354_v2 = vld [vmem:[%s1643_s14 + $0x14] ss:$0 sps:$4 sm:$0x11]  }
  0x1f   : > { %491 = vrot.lane.b32.xlu1 %v1646_v0, %s1525_s27  ;;  %v1655_v3 = vld [vmem:[%s1643_s14] sm:$0xff]   ;;  %489 = vrot.lane.b32.xlu0 %v1649_v1, %s1525_s27  ;;  %v447_v4 = vrot.slane %v1649_v1, 1  ;;  %v448_v5 = vrot.slane %v1354_v2, 1  ;;  %v1356_v6 = vld [vmem:[%s1643_s14 + $0x8] ss:$0 sps:$4 sm:$0x11]  }
  0x20   : > { %v444_v7 = vrot.slane %v1655_v3, 1  ;;  %v332_v8 = vshrl.u32 %v1655_v3, 16  ;;  %v334_v9 = vshll.u32 %v1655_v3, 16  ;;  %v344_v10 = vshrl.u32 %v1649_v1, 16  ;;  %v1672_v22 = vld [vmem:[%s1643_s14 + $0x24] sm:$0xff]   ;;  %v1706_v52 = vld [vmem:[%s1643_s14 + $0x54] sm:$0xff]  }
  0x21   : > { %v449_v11 = vsel %vm443_vm0, %v447_v4, %v448_v5  ;;  %v445_v12 = vrot.slane %v1356_v6, 1  ;;  %v339_v13 = vshll.u32 %v1356_v6, 16  ;;  %v1357_v14 = vld [vmem:[%s1643_s14 + $0x20] ss:$0 sps:$4 sm:$0x11]   ;;  %v346_v15 = vshll.u32 %v1649_v1, 16 }
  0x22   : > { %v336_v16 = vrot.slane %v334_v9, 1  ;;  %v351_v17 = vshll.u32 %v1354_v2, 16  ;;  %v358_v18 = vshll.u32 %v1646_v0, 16  ;;  %v450_v24 = vrot.slane %v1646_v0, 1  ;;  %v1689_v38 = vld [vmem:[%s1643_s14 + $0x48] sm:$0xff]   ;;  %v1717_v59 = vld [vmem:[%s1643_s14 + $0x60] sm:$0xff]  }
  0x23   : > { %539 = vrot.lane.b32.xlu0 %v449_v11, %s1526_s30  ;;  %v446_v19 = vsel %vm443_vm0, %v444_v7, %v445_v12  ;;  %v341_v20 = vrot.slane %v339_v13, 1  ;;  %v348_v21 = vrot.slane %v346_v15, 1  ;;  %v356_v26 = vshrl.u32 %v1646_v0, 16  ;;  %v1680_v32 = vld [vmem:[%s1643_s14 + $0x2c] ss:$0 sps:$4 sm:$0x11]  }
  0x24   : > { %468 = vrot.lane.b32.xlu1 %v446_v19, %s1527_s5  ;;  %v337_v23 = vor.u32 %v336_v16, %v332_v8  ;;  %v353_v25 = vrot.slane %v351_v17, 1  ;;  %v451_v27 = vrot.slane %v1357_v14, 1  ;;  %v360_v29 = vrot.slane %v358_v18, 1  ;;  %v1365_v44 = vld [vmem:[%s1643_s14 + $0x50] ss:$0 sps:$4 sm:$0x11]  }
  0x25   : > { %v349_v28 = vor.u32 %v348_v21, %v344_v10  ;;  %v363_v30 = vshll.u32 %v1357_v14, 16  ;;  %v370_v33 = vshll.u32 %v1672_v22, 16  ;;  %v368_v39 = vshrl.u32 %v1672_v22, 16  ;;  %v1367_v54 = vld [vmem:[%s1643_s14 + $0x5c] ss:$0 sps:$4 sm:$0x11]  }
  0x26   : > { %v342_v31 = vsel %vm330_vm1, %v337_v23, %v341_v20  ;;  %v1686_v35 = vsel %vm443_vm0, %v450_v24, %v451_v27  ;;  %v361_v36 = vor.u32 %v360_v29, %v356_v26  ;;  %v375_v41 = vshll.u32 %v1680_v32, 16  ;;  %v1722_v2 = vld [vmem:[%s1643_s14 + $0x6c] sm:$0xff]   ;;  %v1369_v6 = vld [vmem:[%s1643_s14 + $0x68] ss:$0 sps:$4 sm:$0x11]  }
  0x27   : > { %427 = vrot.lane.b32.xlu0 %v342_v31, %s1528_s6  ;;  %v354_v34 = vsel %vm330_vm1, %v349_v28, %v353_v25  ;;  %v365_v37 = vrot.slane %v363_v30, 1  ;;  %v372_v40 = vrot.slane %v370_v33, 1  ;;  %v453_v43 = vrot.slane %v1672_v22, 1  ;;  %v1371_v18 = vld [vmem:[%s1643_s14 + $0x74] ss:$0 sps:$4 sm:$0x11]  }
  0x28   : > { %470 = vrot.lane.b32.xlu1 %v449_v11, %s1527_s5  ;;  %v404_v45 = vshrl.u32 %v1689_v38, 16  ;;  %v406_v46 = vshll.u32 %v1689_v38, 16  ;;  %v462_v47 = vrot.slane %v1689_v38, 1  ;;  %v377_v49 = vrot.slane %v375_v41, 1  ;;  %v1759_v30 = vld [vmem:[%s1643_s14 + $0x30] sm:$0xff]   ;;  %v1373_v33 = vld [vmem:[%s2117_s1 + $0x8] sm:$0xff]  }
  0x29   : > { %v1697_v42 = vsel %vm330_vm1, %v361_v36, %v365_v37  ;;  %v373_v48 = vor.u32 %v372_v40, %v368_v39  ;;  %v411_v50 = vshll.u32 %v1365_v44, 16  ;;  %v463_v51 = vrot.slane %v1365_v44, 1  ;;  %v1372_v25 = vld [vmem:[%s2117_s1 + $0x10] ss:$0 sps:$4 sm:$0x33]  }
  0x2a   : > { %v408_v53 = vrot.slane %v406_v46, 1  ;;  %v454_v55 = vrot.slane %v1680_v32, 1  ;;  %v416_v58 = vshrl.u32 %v1706_v52, 16  ;;  %v418_v61 = vshll.u32 %v1706_v52, 16  ;;  %1259 = vmatprep.subr.msk.bf16.mxu0 %vm799_vm2, %v1372_v25  ;;  %v1374_v46 = vld [vmem:[%s2117_s1] sm:$0xff]   ;;  %1260 = vmatprep.subr.msk.bf16.mxu1 %vm799_vm2, %v1372_v25 }
  0x2b   : > { %429 = vrot.lane.b32.xlu0 %v354_v34, %s1528_s6  ;;  %v413_v56 = vrot.slane %v411_v50, 1  ;;  %v1713_v57 = vsel %vm443_vm0, %v462_v47, %v463_v51  ;;  %v423_v62 = vshll.u32 %v1367_v54, 16  ;;  %v465_v63 = vrot.slane %v1706_v52, 1  ;;  %v1361_v41 = vld [vmem:[%s1643_s14 + $0x38] ss:$0 sps:$4 sm:$0x11]  }
  0x2c   : > { %541 = vrot.lane.b32.xlu1 %v1686_v35, %s1526_s30  ;;  %v409_v60 = vor.u32 %v408_v53, %v404_v45  ;;  %v1727_v4 = vsel %vm330_vm1, %v373_v48, %v377_v49  ;;  %v466_v5 = vrot.slane %v1367_v54, 1  ;;  %v509_v7 = vshrl.u32 %v1717_v59, 16  ;;  %v1793_v50 = vld [vmem:[%s1643_s14 + $0x3c] sm:$0xff]   ;;  %v1363_v54 = vld [vmem:[%s1643_s14 + $0x44] ss:$0 sps:$4 sm:$0x11]  }
  0x2d   : > { %v511_v8 = vshll.u32 %v1717_v59, 16  ;;  %v420_v10 = vrot.slane %v418_v61, 1  ;;  %v425_v11 = vrot.slane %v423_v62, 1  ;;  %v536_v12 = vrot.slane %v1717_v59, 1  ;;  %s1960_s14 = sand.u32 1, %s1499_s16  }
  0x2e   : > { %v1735_v9 = vsel %vm330_vm1, %v409_v60, %v413_v56  ;;  %v1739_v13 = vsel %vm443_vm0, %v465_v63, %v466_v5  ;;  %v516_v15 = vshll.u32 %v1369_v6, 16  ;;  %v537_v16 = vrot.slane %v1369_v6, 1 }
  0x2f   : > { %520 = vrot.lane.b32.xlu0 %v354_v34, %s1529_s8  ;;  %v513_v14 = vrot.slane %v511_v8, 1  ;;  %v421_v17 = vor.u32 %v420_v10, %v416_v58  ;;  %v580_v19 = vshrl.u32 %v1722_v2, 16  ;;  %v582_v24 = vshll.u32 %v1722_v2, 16 }
  0x30   : > { %522 = vrot.lane.b32.xlu1 %v1697_v42, %s1529_s8  ;;  %v518_v21 = vrot.slane %v516_v15, 1  ;;  %v1746_v23 = vsel %vm443_vm0, %v536_v12, %v537_v16  ;;  %v587_v27 = vshll.u32 %v1371_v18, 16  ;;  %v607_v28 = vrot.slane %v1722_v2, 1 }
  0x31   : > { %v514_v20 = vor.u32 %v513_v14, %v509_v7  ;;  %v1755_v26 = vsel %vm330_vm1, %v421_v17, %v425_v11  ;;  %v608_v29 = vrot.slane %v1371_v18, 1  ;;  %v584_v32 = vrot.slane %v582_v24, 1 }
  0x32   : > { %v589_v34 = vrot.slane %v587_v27, 1  ;;  %v801_v39 = vsel %vm799_vm2, %v1372_v25, 0  ;;  %v455_v40 = vsel %vm443_vm0, %v453_v43, %v454_v55  ;;  %v382_v44 = vshll.u32 %v1759_v30, 16 }
  0x33   : > { %560 = vrot.lane.b32.xlu0 %v1646_v0, %s1530_s9  ;;  %v1762_v31 = vsel %vm330_vm1, %v514_v20, %v518_v21  ;;  %v1768_v36 = vsel %vm443_vm0, %v607_v28, %v608_v29  ;;  %v585_v37 = vor.u32 %v584_v32, %v580_v19  ;;  %1232 = vmatpush3.bf16.msra.mxu0 %v801_v39  ;;  %v387_v47 = vshll.u32 %v1361_v41, 16 }
  0x34   : > { %562 = vrot.lane.b32.xlu1 %v1672_v22, %s1530_s9  ;;  %1233 = vmatprep.subr.bf16.mxu0 %v1373_v33  ;;  %v384_v43 = vrot.slane %v382_v44, 1  ;;  %v456_v53 = vrot.slane %v1759_v30, 1  ;;  %v394_v55 = vshll.u32 %v1793_v50, 16  ;;  %v392_v58 = vshrl.u32 %v1793_v50, 16 }
  0x35   : > { %v1780_v45 = vsel %vm330_vm1, %v585_v37, %v589_v34  ;;  %1256 = vmatpush3.bf16.msra.mxu1 %v801_v39  ;;  %v389_v49 = vrot.slane %v387_v47, 1  ;;  %v399_v61 = vshll.u32 %v1363_v54, 16  ;;  %v459_v5 = vrot.slane %v1793_v50, 1 }
  0x36   : > { %1254 = vmatprep.subr.bf16.mxu1 %v1373_v33  ;;  %v396_v60 = vrot.slane %v394_v55, 1  ;;  %v460_v6 = vrot.slane %v1363_v54, 1 }
  0x37   : > { %591 = vrot.lane.b32.xlu0 %v1697_v42, %s1531_s10  ;;  %1234 = vmatpush3.bf16.msra.mxu0 %v1373_v33  ;;  %v401_v63 = vrot.slane %v399_v61, 1 }
  0x38   : > { %593 = vrot.lane.b32.xlu1 %v1727_v4, %s1531_s10  ;;  %1235 = vmatprep.subr.bf16.mxu0 %v1374_v46  ;;  %v397_v62 = vor.u32 %v396_v60, %v392_v58  ;;  %v461_v7 = vsel %vm443_vm0, %v459_v5, %v460_v6 }
  0x39   : > { %1257 = vmatpush3.bf16.msra.mxu1 %v1373_v33 }
  0x3a   : > { %1255 = vmatprep.subr.bf16.mxu1 %v1374_v46 }
  0x3b   : > { %610 = vrot.lane.b32.xlu0 %v1686_v35, %s1532_s12  ;;  %1236 = vmatpush3.bf16.msra.mxu0 %v1374_v46 }
  0x3c   : > { %431 = vrot.lane.b32.xlu1 %v1697_v42, %s1528_s6  ;;  %v380_v42 = vshrl.u32 %v1759_v30, 16 }
  0x3d   : > { %1258 = vmatpush3.bf16.msra.mxu1 %v1374_v46 }
  0x3e   : > { %v385_v48 = vor.u32 %v384_v43, %v380_v42 }
  0x3f   : > { %612 = vrot.lane.b32.xlu0 %v455_v40, %s1532_s12 }
  0x40   : > { %433 = vrot.lane.b32.xlu1 %v1727_v4, %s1528_s6  ;;  %v390_v51 = vsel %vm330_vm1, %v385_v48, %v389_v49 }
  0x43   : > { %472 = vrot.lane.b32.xlu0 %v1686_v35, %s1527_s5  ;;  %v457_v35 = vrot.slane %v1361_v41, 1 }
  0x44   : > { %474 = vrot.lane.b32.xlu1 %v455_v40, %s1527_s5 }
  0x45   : > { %v458_v56 = vsel %vm443_vm0, %v456_v53, %v457_v35 }
  0x47   : > { %493 = vrot.lane.b32.xlu0 %v1672_v22, %s1525_s27 }
  0x48   : > { %495 = vrot.lane.b32.xlu1 %v1759_v30, %s1525_s27 }
  0x4b   : > { %524 = vrot.lane.b32.xlu0 %v1727_v4, %s1529_s8  ;;  %v402_v4 = vsel %vm330_vm1, %v397_v62, %v401_v63 }
  0x4c   : > { %526 = vrot.lane.b32.xlu1 %v390_v51, %s1529_s8 }
  0x4f   : > { %543 = vrot.lane.b32.xlu0 %v455_v40, %s1526_s30 }
  0x50   : > { %545 = vrot.lane.b32.xlu1 %v458_v56, %s1526_s30 }
  0x53   : > { %564 = vrot.lane.b32.xlu0 %v1759_v30, %s1530_s9 }
  0x54   : > { %566 = vrot.lane.b32.xlu1 %v1793_v50, %s1530_s9 }
  0x57   : > { %595 = vrot.lane.b32.xlu0 %v390_v51, %s1531_s10 }
  0x58   : > { %597 = vrot.lane.b32.xlu1 %v402_v4, %s1531_s10 }
  0x5b   : > { %614 = vrot.lane.b32.xlu0 %v458_v56, %s1532_s12 }
  0x5c   : > { %435 = vrot.lane.b32.xlu1 %v390_v51, %s1528_s6 }
  0x5f   : > { %616 = vrot.lane.b32.xlu0 %v461_v7, %s1532_s12 }
  0x60   : > { %437 = vrot.lane.b32.xlu1 %v402_v4, %s1528_s6 }
  0x63   : > { %476 = vrot.lane.b32.xlu0 %v458_v56, %s1527_s5 }
  0x64   : > { %478 = vrot.lane.b32.xlu1 %v461_v7, %s1527_s5 }
  0x67   : > { %497 = vrot.lane.b32.xlu0 %v1793_v50, %s1525_s27 }
  0x68   : > { %499 = vrot.lane.b32.xlu1 %v1689_v38, %s1525_s27 }
  0x6b   : > { %528 = vrot.lane.b32.xlu0 %v402_v4, %s1529_s8 }
  0x6c   : > { %530 = vrot.lane.b32.xlu1 %v1735_v9, %s1529_s8 }
  0x6f   : > { %547 = vrot.lane.b32.xlu0 %v461_v7, %s1526_s30 }
  0x70   : > { %549 = vrot.lane.b32.xlu1 %v1713_v57, %s1526_s30 }
  0x73   : > { %568 = vrot.lane.b32.xlu0 %v1689_v38, %s1530_s9 }
  0x74   : > { %570 = vrot.lane.b32.xlu1 %v1706_v52, %s1530_s9 }
  0x77   : > { %599 = vrot.lane.b32.xlu0 %v1735_v9, %s1531_s10 }
  0x78   : > { %601 = vrot.lane.b32.xlu1 %v1755_v26, %s1531_s10 }
  0x7b   : > { %618 = vrot.lane.b32.xlu0 %v1713_v57, %s1532_s12 }
  0x7c   : > { %439 = vrot.lane.b32.xlu1 %v1735_v9, %s1528_s6 }
  0x7f   : > { %620 = vrot.lane.b32.xlu0 %v1739_v13, %s1532_s12 }
  0x80   : > { %441 = vrot.lane.b32.xlu1 %v1755_v26, %s1528_s6  ;;  %s1219_s6 = sshll.u32 %s1507_s18, 4 }
  0x83   : > { %480 = vrot.lane.b32.xlu0 %v1713_v57, %s1527_s5 }
  0x84   : > { %482 = vrot.lane.b32.xlu1 %v1739_v13, %s1527_s5 }
  0x87   : > { %501 = vrot.lane.b32.xlu0 %v1706_v52, %s1525_s27 }
  0x88   : > { %503 = vrot.lane.b32.xlu1 %v1717_v59, %s1525_s27  ;;  %s1171_s27 = sshll.u32 %s1960_s14, 7 }
  0x8b   : > { %532 = vrot.lane.b32.xlu0 %v1755_v26, %s1529_s8 }
  0x8c   : > { %534 = vrot.lane.b32.xlu1 %v1762_v31, %s1529_s8  ;;  %s1210_s8 = sshll.u32 %s1511_s19, 5 }
  0x8f   : > { %551 = vrot.lane.b32.xlu0 %v1739_v13, %s1526_s30 }
  0x90   : > { %553 = vrot.lane.b32.xlu1 %v1746_v23, %s1526_s30  ;;  %s1963_s30 = scalar_lea.vmem [#allocation2], %s1171_s27 }
  0x91   : > { %v492_v57 = vpop.permute.xlu1 %491  ;;  %v490_v8 = vpop.permute.xlu0 %489 }
  0x93   : > { %572 = vrot.lane.b32.xlu0 %v1717_v59, %s1530_s9 }
  0x94   : > { %574 = vrot.lane.b32.xlu1 %v1722_v2, %s1530_s9  ;;  %s998_s9 = sadd.s32 %s1219_s6, %s1210_s8 }
  0x95   : > { %v540_v9 = vpop.permute.xlu0 %539 }
  0x96   : > { %v469_v10 = vpop.permute.xlu1 %468 }
  0x97   : > { %603 = vrot.lane.b32.xlu0 %v1762_v31, %s1531_s10 }
  0x98   : > { %605 = vrot.lane.b32.xlu1 %v1780_v45, %s1531_s10  ;;  %s1001_s10 = sshll.u32 %s1963_s30, 4  ;;  %s1982_s10 = int_to_ptr.vmem [resolvable:$true] %s1001_s10 }
  0x99   : > { %v428_v11 = vpop.permute.xlu0 %427  ;;  %s1375_s8 = scalar_lea.vmem %s1982_s10, 2048 }
  0x9a   : > { %v471_v12 = vpop.permute.xlu1 %470  ;;  %v628_v2 = vsel %vm626_vm3, %v1655_v3, %v428_v11  ;;  %p1376_p13 = scmp.ne.s32.totalorder %s1982_s10, %s1375_s8 }
  0x9b   : > { %622 = vrot.lane.b32.xlu0 %v1746_v23, %s1532_s12  ;;  %v645_v17 = vsel %vm643_vm4, %v628_v2, %v469_v10 }
  0x9c   : > { %624 = vrot.lane.b32.xlu1 %v1768_v36, %s1532_s12  ;;  %v662_v21 = vsel %vm660_vm5, %v645_v17, %v490_v8  ;;  %s1211_s12 = sshll.u32 %s998_s9, 7  ;;  %p1377_p0 = pnand %p1376_p13, %p1615_p3 }
  0x9d   : > { %v430_v59 = vpop.permute.xlu0 %429  ;;  %s1988_s27 = scalar_lea.hbm %s2118_s2, %s1211_s12  ;;  %s1533_s9 = smov [#allocation2]  }
  0x9e   : > { %v542_v13 = vpop.permute.xlu1 %541  ;;  %v630_v16 = vsel %vm626_vm3, %v1649_v1, %v430_v59  ;;  %p1378_p1 = pneg %p1377_p0  ;;  %s1379_s24 = sshll.u32 %s1533_s9, 4  ;;  %s1380_s24 = int_to_ptr.vmem [resolvable:$false] %s1379_s24 }
  0x9f   : > { %v647_v19 = vsel %vm643_vm4, %v630_v16, %v471_v12  ;;  %s1381_s23 = scalar_lea.vmem %s1380_s24, 4096  ;;  %p1382_p2 = scmp.lt.s32.totalorder %s1982_s10, %s1380_s24 }
  0xa0   : > { %v664_v3 = vsel %vm660_vm5, %v647_v19, %v492_v57  ;;  %p1383_p4 = scmp.lt.s32.totalorder %s1381_s23, %s1375_s8 }
  0xa1   : > { %v521_v14 = vpop.permute.xlu0 %520 }
  0xa2   : > { %v523_v15 = vpop.permute.xlu1 %522  ;;  %v679_v23 = vsel %vm677_vm6, %v662_v21, %v521_v14  ;;  %p1384_p5 = por %p1383_p4, %p1382_p2 }
  0xa3   : > { %v696_v1 = vsel %vm694_vm7, %v679_v23, %v540_v9  ;;  %v681_v26 = vsel %vm677_vm6, %v664_v3, %v523_v15 }
  0xa4   : > { %v698_v33 = vsel %vm694_vm7, %v681_v26, %v542_v13  ;;  %p1385_p6 = pnand %p1384_p5, %p1378_p1 }
  0xa5   : > { %v561_v18 = vpop.permute.xlu0 %560 }
  0xa6   : > { %v563_v20 = vpop.permute.xlu1 %562  ;;  %v713_v27 = vsel %vm711_vm8, %v696_v1, %v561_v18 }
  0xa7   : > { %v715_v34 = vsel %vm711_vm8, %v698_v33, %v563_v20 }
  0xa9   : > { %v592_v24 = vpop.permute.xlu0 %591 }
  0xaa   : > { %v594_v25 = vpop.permute.xlu1 %593  ;;  %v730_v28 = vsel %vm728_vm9, %v713_v27, %v592_v24 }
  0xab   : > { %v732_v36 = vsel %vm728_vm9, %v715_v34, %v594_v25 }
  0xad   : > { %v611_v29 = vpop.permute.xlu0 %610 }
  0xae   : > { %v432_v31 = vpop.permute.xlu1 %431  ;;  %v747_v32 = vsel %vm745_vm10, %v730_v28, %v611_v29 }
  0xaf   : > { %1237 = vmatprep.mubr.msk.bf16.mxu0 %vm782_vm11, %v747_v32  ;;  %v632_v53 = vsel %vm626_vm3, %v1646_v0, %v432_v31 }
  0xb1   : > { %v613_v37 = vpop.permute.xlu0 %612 }
  0xb2   : > { %v434_v39 = vpop.permute.xlu1 %433  ;;  %v749_v40 = vsel %vm745_vm10, %v732_v36, %v613_v37 }
  0xb3   : > { %1238 = vmatmul.mubr.msk.bf16.vlgmr.msra.gmra.mxu0 %vm782_vm11, %v749_v40  ;;  %v634_v60 = vsel %vm626_vm3, %v1672_v22, %v434_v39 }
  0xb5   : > { %v473_v41 = vpop.permute.xlu0 %472 }
  0xb6   : > { %v475_v44 = vpop.permute.xlu1 %474  ;;  %v649_v35 = vsel %vm643_vm4, %v632_v53, %v473_v41 }
  0xb7   : > { %v651_v62 = vsel %vm643_vm4, %v634_v60, %v475_v44 }
  0xb9   : > { %v494_v45 = vpop.permute.xlu0 %493 }
  0xba   : > { %v496_v46 = vpop.permute.xlu1 %495  ;;  %v666_v54 = vsel %vm660_vm5, %v649_v35, %v494_v45 }
  0xbb   : > { %v668_v4 = vsel %vm660_vm5, %v651_v62, %v496_v46 }
  0xbd   : > { %v525_v42 = vpop.permute.xlu0 %524 }
  0xbe   : > { %v527_v43 = vpop.permute.xlu1 %526  ;;  %v683_v56 = vsel %vm677_vm6, %v666_v54, %v525_v42 }
  0xbf   : > { %v685_v6 = vsel %vm677_vm6, %v668_v4, %v527_v43 }
  0xc1   : > { %v544_v47 = vpop.permute.xlu0 %543 }
  0xc2   : > { %v546_v48 = vpop.permute.xlu1 %545  ;;  %v700_v61 = vsel %vm694_vm7, %v683_v56, %v544_v47 }
  0xc3   : > { %v702_v8 = vsel %vm694_vm7, %v685_v6, %v546_v48 }
  0xc5   : > { %v565_v49 = vpop.permute.xlu0 %564 }
  0xc6   : > { %v567_v51 = vpop.permute.xlu1 %566  ;;  %v717_v63 = vsel %vm711_vm8, %v700_v61, %v565_v49 }
  0xc7   : > { %v719_v22 = vsel %vm711_vm8, %v702_v8, %v567_v51 }
  0xc9   : > { %v596_v55 = vpop.permute.xlu0 %595 }
  0xca   : > { %v598_v58 = vpop.permute.xlu1 %597  ;;  %v734_v0 = vsel %vm728_vm9, %v717_v63, %v596_v55 }
  0xcb   : > { %v736_v9 = vsel %vm728_vm9, %v719_v22, %v598_v58 }
  0xcd   : > { %v615_v5 = vpop.permute.xlu0 %614 }
  0xce   : > { %v436_v7 = vpop.permute.xlu1 %435  ;;  %v751_v57 = vsel %vm745_vm10, %v734_v0, %v615_v5 }
  0xcf   : > { %1241 = vmatprep.mubr.msk.bf16.mxu0 %vm782_vm11, %v751_v57  ;;  %v636_v21 = vsel %vm626_vm3, %v1759_v30, %v436_v7 }
  0xd1   : > { %v617_v10 = vpop.permute.xlu0 %616 }
  0xd2   : > { %v438_v11 = vpop.permute.xlu1 %437  ;;  %v753_v12 = vsel %vm745_vm10, %v736_v9, %v617_v10 }
  0xd3   : > { %1242 = vmatmul.mubr.msk.bf16.gmra.mxu0 %vm782_vm11, %v753_v12  ;;  %v638_v26 = vsel %vm626_vm3, %v1793_v50, %v438_v11 }
  0xd5   : > { %v477_v59 = vpop.permute.xlu0 %476 }
  0xd6   : > { %v479_v13 = vpop.permute.xlu1 %478  ;;  %v653_v23 = vsel %vm643_vm4, %v636_v21, %v477_v59 }
  0xd7   : > { %v655_v28 = vsel %vm643_vm4, %v638_v26, %v479_v13 }
  0xd9   : > { %v498_v2 = vpop.permute.xlu0 %497 }
  0xda   : > { %v500_v14 = vpop.permute.xlu1 %499  ;;  %v670_v3 = vsel %vm660_vm5, %v653_v23, %v498_v2 }
  0xdb   : > { %v672_v31 = vsel %vm660_vm5, %v655_v28, %v500_v14 }
  0xdd   : > { %v529_v15 = vpop.permute.xlu0 %528 }
  0xde   : > { %v531_v16 = vpop.permute.xlu1 %530  ;;  %v687_v25 = vsel %vm677_vm6, %v670_v3, %v529_v15 }
  0xdf   : > { %v689_v33 = vsel %vm677_vm6, %v672_v31, %v531_v16 }
  0xe1   : > { %v548_v17 = vpop.permute.xlu0 %547 }
  0xe2   : > { %v550_v18 = vpop.permute.xlu1 %549  ;;  %v704_v27 = vsel %vm694_vm7, %v687_v25, %v548_v17 }
  0xe3   : > { %v706_v37 = vsel %vm694_vm7, %v689_v33, %v550_v18 }
  0xe5   : > { %v569_v19 = vpop.permute.xlu0 %568 }
  0xe6   : > { %v571_v20 = vpop.permute.xlu1 %570  ;;  %v721_v29 = vsel %vm711_vm8, %v704_v27, %v569_v19 }
  0xe7   : > { %v723_v50 = vsel %vm711_vm8, %v706_v37, %v571_v20 }
  0xe9   : > { %v600_v24 = vpop.permute.xlu0 %599 }
  0xea   : > { %v602_v1 = vpop.permute.xlu1 %601  ;;  %v738_v30 = vsel %vm728_vm9, %v721_v29, %v600_v24 }
  0xeb   : > { %v740_v39 = vsel %vm728_vm9, %v723_v50, %v602_v1 }
  0xed   : > { %v619_v32 = vpop.permute.xlu0 %618 }
  0xee   : > { %v440_v34 = vpop.permute.xlu1 %439  ;;  %v755_v36 = vsel %vm745_vm10, %v738_v30, %v619_v32 }
  0xef   : > { %1245 = vmatprep.mubr.msk.bf16.mxu1 %vm782_vm11, %v755_v36  ;;  %v640_v54 = vsel %vm626_vm3, %v1689_v38, %v440_v34 }
  0xf1   : > { %v621_v40 = vpop.permute.xlu0 %620 }
  0xf2   : > { %v442_v41 = vpop.permute.xlu1 %441  ;;  %v757_v44 = vsel %vm745_vm10, %v740_v39, %v621_v40 }
  0xf3   : > { %1246 = vmatmul.mubr.msk.bf16.vlgmr.msra.gmra.mxu1 %vm782_vm11, %v757_v44  ;;  %v642_v55 = vsel %vm626_vm3, %v1706_v52, %v442_v41 }
  0xf5   : > { %v481_v45 = vpop.permute.xlu0 %480 }
  0xf6   : > { %v483_v46 = vpop.permute.xlu1 %482  ;;  %v657_v56 = vsel %vm643_vm4, %v640_v54, %v481_v45 }
  0xf7   : > { %v659_v58 = vsel %vm643_vm4, %v642_v55, %v483_v46 }
  0xf9   : > { %v502_v42 = vpop.permute.xlu0 %501 }
  0xfa   : > { %v504_v43 = vpop.permute.xlu1 %503  ;;  %v674_v60 = vsel %vm660_vm5, %v657_v56, %v502_v42 }
  0xfb   : > { %v676_v62 = vsel %vm660_vm5, %v659_v58, %v504_v43 }
  0xfd   : > { %v533_v47 = vpop.permute.xlu0 %532 }
  0xfe   : > { %v535_v48 = vpop.permute.xlu1 %534  ;;  %v691_v63 = vsel %vm677_vm6, %v674_v60, %v533_v47 }
  0xff   : > { %v693_v0 = vsel %vm677_vm6, %v676_v62, %v535_v48 }
 0x101   : > { %v552_v49 = vpop.permute.xlu0 %551 }
 0x102   : > { %v554_v51 = vpop.permute.xlu1 %553  ;;  %v708_v38 = vsel %vm694_vm7, %v691_v63, %v552_v49 }
 0x103   : > { %v710_v5 = vsel %vm694_vm7, %v693_v0, %v554_v51 }
 0x105   : > { %v573_v53 = vpop.permute.xlu0 %572 }
 0x106   : > { %v575_v35 = vpop.permute.xlu1 %574  ;;  %v725_v52 = vsel %vm711_vm8, %v708_v38, %v573_v53 }
 0x107   : > { %v727_v6 = vsel %vm711_vm8, %v710_v5, %v575_v35 }
 0x109   : > { %v604_v61 = vpop.permute.xlu0 %603 }
 0x10a   : > { %v606_v4 = vpop.permute.xlu1 %605  ;;  %v742_v7 = vsel %vm728_vm9, %v725_v52, %v604_v61 }
 0x10b   : > { %v744_v8 = vsel %vm728_vm9, %v727_v6, %v606_v4 }
 0x10d   : > { %v623_v57 = vpop.permute.xlu0 %622 }
 0x10e   : > { %v625_v22 = vpop.permute.xlu1 %624  ;;  %v759_v9 = vsel %vm745_vm10, %v742_v7, %v623_v57 }
 0x10f   : > { %v761_v10 = vsel %vm745_vm10, %v744_v8, %v625_v22  ;;  %1249 = vmatprep.mubr.msk.bf16.mxu1 %vm782_vm11, %v759_v9 }
 0x110   : > { %1250 = vmatmul.mubr.msk.bf16.gmra.mxu1 %vm782_vm11, %v761_v10 }
 0x173   : > { %v1239_v11 = vpop.f32.mrf.mxu0 }
 0x174   : > { %902 = vst [vmem:[%s1963_s30 + $0x10] sm:$0xff] %v1239_v11  ;;  %v940_v16 = vmul.f32 %v1239_v11, %v1239_v11 }
 0x175   : > { %v837_v12 = vpop.f32.mrf.mxu0 }
 0x176   : > { %900 = vst [vmem:[%s1963_s30] sm:$0xff] %v837_v12  ;;  %v938_v2 = vmul.f32 %v837_v12, %v837_v12 }
 0x177   : > { %v1240_v59 = vpop.f32.mrf.mxu0 }
 0x178   : > { %903 = vst [vmem:[%s1963_s30 + $0x18] sm:$0xff] %v1240_v59  ;;  %v941_v19 = vmul.f32 %v1240_v59, %v1240_v59 }
 0x179   : > { %v840_v13 = vpop.f32.mrf.mxu0 }
 0x17a   : > { %901 = vst [vmem:[%s1963_s30 + $0x8] sm:$0xff] %v840_v13  ;;  %v916_v14 = vadd.f32 %v840_v13, %v837_v12  ;;  %v939_v15 = vmul.f32 %v840_v13, %v840_v13 }
 0x17c   : > { %v917_v17 = vadd.f32 %v1239_v11, %v916_v14  ;;  %v954_v18 = vadd.f32 %v939_v15, %v938_v2 }
 0x17e   : > { %v955_v20 = vadd.f32 %v954_v18, %v940_v16  ;;  %v918_v21 = vadd.f32 %v1240_v59, %v917_v17 }
 0x180   : > { %v956_v23 = vadd.f32 %v955_v20, %v941_v19 }
 0x193   : > { %v1243_v3 = vpop.f32.mrf.mxu0 }
 0x194   : > { %906 = vst [vmem:[%s1963_s30 + $0x30] sm:$0xff] %v1243_v3  ;;  %v944_v37 = vmul.f32 %v1243_v3, %v1243_v3 }
 0x195   : > { %v853_v24 = vpop.f32.mrf.mxu0 }
 0x196   : > { %904 = vst [vmem:[%s1963_s30 + $0x20] sm:$0xff] %v853_v24  ;;  %v942_v31 = vmul.f32 %v853_v24, %v853_v24  ;;  %v919_v30 = vadd.f32 %v918_v21, %v853_v24 }
 0x197   : > { %v1244_v25 = vpop.f32.mrf.mxu0 }
 0x198   : > { %907 = vst [vmem:[%s1963_s30 + $0x38] sm:$0xff] %v1244_v25  ;;  %v957_v33 = vadd.f32 %v956_v23, %v942_v31  ;;  %v945_v40 = vmul.f32 %v1244_v25, %v1244_v25 }
 0x199   : > { %v856_v1 = vpop.f32.mrf.mxu0 }
 0x19a   : > { %905 = vst [vmem:[%s1963_s30 + $0x28] sm:$0xff] %v856_v1  ;;  %v943_v32 = vmul.f32 %v856_v1, %v856_v1  ;;  %v920_v34 = vadd.f32 %v919_v30, %v856_v1 }
 0x19c   : > { %v958_v36 = vadd.f32 %v957_v33, %v943_v32  ;;  %v921_v50 = vadd.f32 %v1243_v3, %v920_v34 }
 0x19e   : > { %v959_v39 = vadd.f32 %v958_v36, %v944_v37  ;;  %v922_v41 = vadd.f32 %v1244_v25, %v921_v50 }
 0x1a0   : > { %v960_v46 = vadd.f32 %v959_v39, %v945_v40 }
 0x1b3   : > { %v1247_v26 = vpop.f32.mrf.mxu1 }
 0x1b4   : > { %910 = vst [vmem:[%s1963_s30 + $0x50] sm:$0xff] %v1247_v26  ;;  %v948_v49 = vmul.f32 %v1247_v26, %v1247_v26 }
 0x1b5   : > { %v869_v27 = vpop.f32.mrf.mxu1 }
 0x1b6   : > { %908 = vst [vmem:[%s1963_s30 + $0x40] sm:$0xff] %v869_v27  ;;  %v946_v44 = vmul.f32 %v869_v27, %v869_v27  ;;  %v923_v45 = vadd.f32 %v922_v41, %v869_v27 }
 0x1b7   : > { %v1248_v28 = vpop.f32.mrf.mxu1 }
 0x1b8   : > { %911 = vst [vmem:[%s1963_s30 + $0x58] sm:$0xff] %v1248_v28  ;;  %v961_v43 = vadd.f32 %v960_v46, %v946_v44  ;;  %v949_v55 = vmul.f32 %v1248_v28, %v1248_v28 }
 0x1b9   : > { %v872_v29 = vpop.f32.mrf.mxu1 }
 0x1ba   : > { %909 = vst [vmem:[%s1963_s30 + $0x48] sm:$0xff] %v872_v29  ;;  %v947_v42 = vmul.f32 %v872_v29, %v872_v29  ;;  %v924_v47 = vadd.f32 %v923_v45, %v872_v29 }
 0x1bc   : > { %v962_v48 = vadd.f32 %v961_v43, %v947_v42  ;;  %v925_v51 = vadd.f32 %v1247_v26, %v924_v47 }
 0x1be   : > { %v963_v35 = vadd.f32 %v962_v48, %v948_v49  ;;  %v926_v56 = vadd.f32 %v1248_v28, %v925_v51 }
 0x1c0   : > { %v964_v62 = vadd.f32 %v963_v35, %v949_v55 }
 0x1d0   : > { %v1251_v53 = vpop.f32.mrf.mxu1 }
 0x1d1   : > { %914 = vst [vmem:[%s1963_s30 + $0x70] sm:$0xff] %v1251_v53 }
 0x1d2   : > { %v885_v54 = vpop.f32.mrf.mxu1 }
 0x1d3   : > { %912 = vst [vmem:[%s1963_s30 + $0x60] sm:$0xff] %v885_v54  ;;  %v950_v58 = vmul.f32 %v885_v54, %v885_v54  ;;  %v927_v61 = vadd.f32 %v926_v56, %v885_v54 }
 0x1d4   : > { %v1252_v60 = vpop.f32.mrf.mxu1 }
 0x1d5   : > { %915 = vst [vmem:[%s1963_s30 + $0x78] sm:$0xff] %v1252_v60  ;;  %v965_v4 = vadd.f32 %v964_v62, %v950_v58 }
 0x1d6   : > { %v888_v63 = vpop.f32.mrf.mxu1 }
 0x1d7   : > { %913 = vst [vmem:[%s1963_s30 + $0x68] sm:$0xff] %v888_v63  ;;  %v928_v0 = vadd.f32 %v927_v61, %v888_v63  ;;  %v951_v38 = vmul.f32 %v888_v63, %v888_v63 }
 0x1d8   : > { %1388 = shalt.err (!%p1385_p6)
}
 0x1d9   : > { %s1389_s30 = scalar_lea.hbm %s1988_s27, 2048  ;;  %s1393_s11 = scalar_lea.hbm %s2118_s2, 8192 }
 0x1da   : > { %p1390_p7 = scmp.ne.s32.totalorder %s1988_s27, %s1389_s30  ;;  %p1394_p11 = scmp.lt.s32.totalorder %s1988_s27, %s2118_s2 }
 0x1db   : > { %p1395_p12 = scmp.lt.s32.totalorder %s1393_s11, %s1389_s30 }
 0x1dc   : > { %p1391_p9 = pnand %p1390_p7, %p1615_p3 }
 0x1dd   : > { %p1396_p13 = por %p1395_p12, %p1394_p11 }
 0x1de   : > { %p1392_p10 = pneg %p1391_p9 }
 0x1e0   : > { %p1397_p0 = pnand %p1396_p13, %p1392_p10 }
 0x1e2   : > { %1400 = shalt.err (!%p1397_p0)
}
 0x1e3   : > { %s1534_s23 = smov 128   ;;  %s2126_s24 = scalar_lea.sflag [#allocation3], %s1960_s14  ;;  %v952_v5 = vmul.f32 %v1251_v53, %v1251_v53  ;;  %v929_v52 = vadd.f32 %v1251_v53, %v928_v0  ;;  %v966_v6 = vadd.f32 %v965_v4, %v951_v38  ;;  %v953_v7 = vmul.f32 %v1252_v60, %v1252_v60 }
 0x1e4   : > { %1262 = dma.vmem_to_hbm [thread:$0]  (%p1615_p3), %s1982_s10, 2048, %s1988_s27, %s2126_s24, %s1534_s23, %s1534_s23, %s1527_s5  }
 0x1e5   : > { %v930_v57 = vadd.f32 %v1252_v60, %v929_v52  ;;  %v967_v8 = vadd.f32 %v966_v6, %v952_v5  ;;  %s1212_s6 = sshll.u32 %s1511_s19, 1  ;;  %s2127_s5 = sadd.s32 4294967295, %s1523_s22  }
 0x1e6   : > { %s1015_s8 = sadd.s32 %s1507_s18, %s1212_s6  ;;  %s2019_s10 = sand.u32 1, %s2127_s5  }
 0x1e7   : > { %v931_v22 = vrot.slane %v930_v57, 4  ;;  %v968_v9 = vadd.f32 %v967_v8, %v953_v7  ;;  %s1213_s27 = sshll.u32 %s1015_s8, 4  ;;  %s218_s30 = scalar_lea.vmem [#allocation4], %s1960_s14 }
 0x1e8   : > { %s1019_s12 = sshll.u32 %s218_s30, 4  ;;  %s2123_s13 = scalar_lea.vmem [#allocation6], %s1960_s14  ;;  %s2030_s12 = int_to_ptr.vmem [resolvable:$true] %s1019_s12 }
 0x1e9   : > { %v932_v10 = vadd.f32 %v931_v22, %v930_v57  ;;  %v969_v11 = vrot.slane %v968_v9, 4  ;;  %s1034_s19 = sshll.u32 %s2123_s13, 4  ;;  %s2028_s18 = scalar_lea.hbm %s2119_s3, %s1213_s27  ;;  %s2037_s19 = int_to_ptr.vmem [resolvable:$true] %s1034_s19 }
 0x1ea   : > { %s2035_s6 = scalar_lea.hbm %s2120_s4, %s1213_s27  ;;  %s1401_s5 = scalar_lea.vmem %s2030_s12, 16 }
 0x1eb   : > { %v970_v12 = vadd.f32 %v969_v11, %v968_v9  ;;  %v933_v59 = vrot.slane %v932_v10, 2  ;;  %p1402_p1 = scmp.ne.s32.totalorder %s2030_s12, %s1401_s5  ;;  %s1535_s11 = smov [#allocation4]  }
 0x1ec   : > { %s1405_s9 = sshll.u32 %s1535_s11, 4  ;;  %s1406_s9 = int_to_ptr.vmem [resolvable:$false] %s1405_s9 }
 0x1ed   : > { %v934_v13 = vadd.f32 %v933_v59, %v932_v10  ;;  %v971_v2 = vrot.slane %v970_v12, 2  ;;  %p1403_p2 = pnand %p1402_p1, %p1615_p3  ;;  %s1407_s13 = scalar_lea.vmem %s1406_s9, 32 }
 0x1ee   : > { %p1408_p5 = scmp.lt.s32.totalorder %s2030_s12, %s1406_s9  ;;  %p1409_p6 = scmp.lt.s32.totalorder %s1407_s13, %s1401_s5 }
 0x1ef   : > { %v935_v14 = vrot.slane %v934_v13, 1  ;;  %v972_v15 = vadd.f32 %v971_v2, %v970_v12  ;;  %p1404_p4 = pneg %p1403_p2 }
 0x1f0   : > { %p1410_p7 = por %p1409_p6, %p1408_p5 }
 0x1f1   : > { %v936_v16 = vadd.f32 %v935_v14, %v934_v13  ;;  %v973_v17 = vrot.slane %v972_v15, 1 }
 0x1f2   : > { %p1411_p9 = pnand %p1410_p7, %p1404_p4 }
 0x1f3   : > { %937 = vst [vmem:[%s218_s30] sm:$0x1] %v936_v16  ;;  %v974_v18 = vadd.f32 %v973_v17, %v972_v15 }
 0x1f4   : > { %1414 = shalt.err (!%p1411_p9)
}
 0x1f5   : > { %s1415_s27 = scalar_lea.hbm %s2028_s18, 16  ;;  %s1419_s24 = scalar_lea.hbm %s2119_s3, 64 }
 0x1f6   : > { %p1416_p10 = scmp.ne.s32.totalorder %s2028_s18, %s1415_s27  ;;  %p1420_p13 = scmp.lt.s32.totalorder %s2028_s18, %s2119_s3 }
 0x1f7   : > { %p1421_p0 = scmp.lt.s32.totalorder %s1419_s24, %s1415_s27 }
 0x1f8   : > { %p1417_p11 = pnand %p1416_p10, %p1615_p3 }
 0x1f9   : > { %p1422_p1 = por %p1421_p0, %p1420_p13 }
 0x1fa   : > { %p1418_p12 = pneg %p1417_p11 }
 0x1fc   : > { %p1423_p2 = pnand %p1422_p1, %p1418_p12 }
 0x1fe   : > { %1426 = shalt.err (!%p1423_p2)
}
 0x1ff   : > { %s2128_s13 = scalar_lea.sflag [#allocation5], %s2019_s10  ;;  %s2129_s5 = scalar_lea.vmem [#allocation6], %s1960_s14 }
 0x200   : > { %1263 = dma.vmem_to_hbm [thread:$0]  (%p1615_p3), %s2030_s12, 16, %s2028_s18, %s2128_s13   ;;  %975 = vst [vmem:[%s2129_s5] sm:$0x1] %v974_v18 }
 0x201   : > { %s1427_s8 = scalar_lea.vmem %s2037_s19, 16  ;;  %s1536_s9 = smov [#allocation6]  }
 0x202   : > { %p1428_p4 = scmp.ne.s32.totalorder %s2037_s19, %s1427_s8  ;;  %s1431_s27 = sshll.u32 %s1536_s9, 4  ;;  %s1432_s27 = int_to_ptr.vmem [resolvable:$false] %s1431_s27 }
 0x203   : > { %s1433_s30 = scalar_lea.vmem %s1432_s27, 32  ;;  %p1434_p7 = scmp.lt.s32.totalorder %s2037_s19, %s1432_s27 }
 0x204   : > { %p1429_p5 = pnand %p1428_p4, %p1615_p3  ;;  %p1435_p9 = scmp.lt.s32.totalorder %s1433_s30, %s1427_s8 }
 0x206   : > { %p1430_p6 = pneg %p1429_p5  ;;  %p1436_p10 = por %p1435_p9, %p1434_p7 }
 0x208   : > { %p1437_p11 = pnand %p1436_p10, %p1430_p6 }
 0x20a   : > { %1440 = shalt.err (!%p1437_p11)
}
 0x20b   : > { %s1441_s14 = scalar_lea.hbm %s2035_s6, 16  ;;  %s1445_s23 = scalar_lea.hbm %s2120_s4, 64 }
 0x20c   : > { %p1442_p12 = scmp.ne.s32.totalorder %s2035_s6, %s1441_s14  ;;  %p1446_p1 = scmp.lt.s32.totalorder %s2035_s6, %s2120_s4 }
 0x20d   : > { %p1447_p2 = scmp.lt.s32.totalorder %s1445_s23, %s1441_s14 }
 0x20e   : > { %p1443_p13 = pnand %p1442_p12, %p1615_p3 }
 0x20f   : > { %p1448_p4 = por %p1447_p2, %p1446_p1 }
 0x210   : > { %p1444_p0 = pneg %p1443_p13 }
 0x212   : > { %p1449_p5 = pnand %p1448_p4, %p1444_p0 }
 0x214   : > { %1452 = shalt.err (!%p1449_p5)
}
 0x215   : > { %1264 = dma.vmem_to_hbm [thread:$0]  (%p1615_p3), %s2037_s19, 16, %s2035_s6, %s2128_s13  }
 0x216 PF: > { %p1278_p6 = scmp.ge.s32.totalorder %s1523_s22, 2  ;;  %s1046_s5 = sand.u32 1, %s1495_s15  }
 0x217   : > { %s1047_s8 = scalar_lea.sflag [#allocation3], %s1046_s5 }
 0x218   : > { %p1269_p7 = pnand %p1278_p6, %p1626_p8 }
 0x21a   : > { %p1270_p9 = pneg %p1269_p7 }
 0x21c   : > { %1486 = dma.done.wait (%p1270_p9), %s1047_s8, 2048  }
 0x21d   : > { %1488 = vsyncadd (%p1270_p9), %s1047_s8, 4294965248  ;;  %s2130_s9 = sadd.s32 4294967294, %s1523_s22  }
 0x21e   : > { %s1055_s28 = sand.u32 1, %s2130_s9  }
 0x21f   : > { %s1056_s27 = scalar_lea.sflag [#allocation5], %s1055_s28 }
 0x220   : > { %1490 = dma.done.wait (%p1270_p9), %s1056_s27, 32  }
 0x221   : > { %1492 = vsyncadd (%p1270_p9), %s1056_s27, 4294967264  ;;  %s21_s22 = sadd.s32 1, %s1523_s22   ;;  %s2131_s15 = smov %s1499_s16 }
 0x222   : > { %p18_p3 = scmp.ge.s32.totalorder %s21_s22, 6   ;;  %s2132_s16 = smov %s1503_s17 }
 0x223   : > { %s2133_s17 = smov %s1635_s7  ;;  %s2134_s18 = smov %s1515_s20 }
 0x224   : > { %s2135_s19 = smov %s1519_s21  ;;  %s2136_s20 = smov %s2139_s25 }
 0x225   : > { %s2137_s21 = smov %s2143_s26  ;;  %20 = sbr.rel (!%p18_p3) target bundleno = 7 (0x7), region = 96 }
 0x22a   :  { %1068 = vsyncpa [#allocation3], 1 }
 0x22b   :  { %1070 = vsyncpa [#allocation3 + $0x1], 1 }
 0x22c   :  { %1071 = vsyncpa [#allocation5], 1 }
 0x22d   :  { %1073 = vsyncpa [#allocation5 + $0x1], 1 }

</bundles_post_ra>
